<compile_context>
chip_gen: v6e
topology: v6e:2x2x1
jax: 0.10.0
libtpu: 0.0.40
codegen_flags: <defaults>
</compile_context>

<pallas_src>
import functools

import jax
import jax.numpy as jnp
from jax.experimental import pallas as pl
from jax.experimental.pallas import tpu as pltpu

SUBLANE_BF16 = 16   # bf16 packs 16 rows per vreg
MXU_ALIGN = 256     # v6e / v7x MXU native tile (multiple of the 128-lane width)


def _round_up(n: int, m: int) -> int:
    return ((n + m - 1) // m) * m


def dqn_kernel(x_ref, w1_ref, w2_ref, w3_ref, slab_ref, alpha_ref, o_ref,
               *, actual_b, hid_p, out_p):
    eps = jnp.float32(1e-5)
    inv_b = jnp.float32(1.0 / actual_b)
    b_pad = x_ref.shape[0]

    # Row-validity mask so padded batch rows never contaminate BN statistics.
    if b_pad == actual_b:
        row_mask = None
    else:
        row_mask = (jax.lax.broadcasted_iota(jnp.int32, (b_pad, 1), 0) < actual_b)

    def masked_sum(v):
        if row_mask is None:
            return jnp.sum(v, axis=0, keepdims=True)
        return jnp.sum(jnp.where(row_mask, v, 0.0), axis=0, keepdims=True)

    def layer(h_bf16, w_ref, gamma, beta, alpha):
        # Linear (bias folded away by BN's mean subtraction). bf16 x bf16 -> f32 on MXU.
        h = jnp.dot(h_bf16, w_ref[...], preferred_element_type=jnp.float32)
        # Training-mode BN with exact batch stats, two-pass (biased) variance.
        mean = masked_sum(h) * inv_b
        d = h - mean
        var = masked_sum(d * d) * inv_b
        scale = gamma * jax.lax.rsqrt(var + eps)
        y = d * scale + beta
        # PReLU with a single shared slope (scalar from SMEM).
        return jnp.where(y > 0, y, alpha * y)

    slab = slab_ref[...]                 # (5, W): g1, be1, g2, be2, b3
    g1, be1 = slab[0:1, :hid_p], slab[1:2, :hid_p]
    g2, be2 = slab[2:3, :hid_p], slab[3:4, :hid_p]
    b3 = slab[4:5, :out_p]

    h1 = layer(x_ref[...].astype(jnp.bfloat16), w1_ref, g1, be1, alpha_ref[0])
    h2 = layer(h1.astype(jnp.bfloat16), w2_ref, g2, be2, alpha_ref[1])
    out = jnp.dot(h2.astype(jnp.bfloat16), w3_ref[...],
                  preferred_element_type=jnp.float32) + b3
    o_ref[...] = out.astype(o_ref.dtype)


def prepare_params(params):
    """One-time operand prep: pad feature dims to MXU alignment, cast weights to bf16,
    and pack BN affine params + final bias into a single small VMEM slab.
    NOTE: b1/b2 are intentionally not included — BN's mean subtraction cancels them."""
    din, hid = params["w1"].shape
    dout = params["w3"].shape[1]
    hid_p = _round_up(max(hid, MXU_ALIGN), MXU_ALIGN)
    out_p = _round_up(max(dout, MXU_ALIGN), MXU_ALIGN)
    slab_w = max(hid_p, out_p)

    w1 = jnp.pad(params["w1"], ((0, 0), (0, hid_p - hid))).astype(jnp.bfloat16)
    w2 = jnp.pad(params["w2"], ((0, hid_p - hid), (0, hid_p - hid))).astype(jnp.bfloat16)
    w3 = jnp.pad(params["w3"], ((0, hid_p - hid), (0, out_p - dout))).astype(jnp.bfloat16)

    def row(v):
        return jnp.pad(v, (0, slab_w - v.shape[0]))

    slab = jnp.stack([row(params["g1"]), row(params["be1"]),
                      row(params["g2"]), row(params["be2"]),
                      row(params["b3"])]).astype(jnp.float32)
    alphas = jnp.stack([params["a1"], params["a2"]]).astype(jnp.float32)  # -> SMEM

    return dict(w1=w1, w2=w2, w3=w3, slab=slab, alphas=alphas,
                dims=(din, hid, dout, hid_p, out_p))


@functools.partial(jax.jit, static_argnames=("dims",))
def _dqn_forward_impl(x, w1, w2, w3, slab, alphas, *, dims):
    _din, _hid, dout, hid_p, out_p = dims
    B = x.shape[0]
    b_pad = _round_up(max(B, SUBLANE_BF16), SUBLANE_BF16)
    # Only a (cheap, sublane-only) batch pad is done per call; at production batch
    # sizes that are multiples of 16 this is a no-op.
    x_p = x if b_pad == B else jnp.pad(x, ((0, b_pad - B), (0, 0)))

    kernel = functools.partial(dqn_kernel, actual_b=B, hid_p=hid_p, out_p=out_p)

    vmem_specs = [pl.BlockSpec(memory_space=pltpu.MemorySpace.VMEM) for _ in range(5)]
    smem_spec = pl.BlockSpec(memory_space=pltpu.MemorySpace.SMEM)

    out_padded = pl.pallas_call(
        kernel,
        out_shape=jax.ShapeDtypeStruct((b_pad, out_p), jnp.float32),
        in_specs=vmem_specs + [smem_spec],
        out_specs=pl.BlockSpec(memory_space=pltpu.MemorySpace.VMEM),
        # TODO(synk): when scaling B / hidden, tile B over a grid (cross-tile BN
        # sum/sumsq accumulators) and/or raise vmem_limit_bytes via
        # pltpu.CompilerParams; unnecessary at demo sizes.
    )(x_p, w1, w2, w3, slab, alphas)

    return out_padded[:B, :dout]


def dqn_forward(x, prep):
    """x: (B, input_dim) f32. prep: output of prepare_params (one-time)."""
    return _dqn_forward_impl(x, prep["w1"], prep["w2"], prep["w3"],
                             prep["slab"], prep["alphas"], dims=prep["dims"])


def init_params(key, input_dim, hidden_dim, output_dim):
    """Deterministic synthetic parameter init matching PyTorch defaults.
    Linear weights stored pre-transposed as (in, out); BN gamma=1, beta=0; PReLU a=0.25.
    b1/b2 kept for the reference path even though the kernel does not need them."""
    ks = jax.random.split(key, 6)

    def lin(kw, kb, fan_in, fan_out):
        bound = 1.0 / jnp.sqrt(fan_in)
        w = jax.random.uniform(kw, (fan_in, fan_out), jnp.float32, -bound, bound)
        b = jax.random.uniform(kb, (fan_out,), jnp.float32, -bound, bound)
        return w, b

    w1, b1 = lin(ks[0], ks[1], input_dim, hidden_dim)
    w2, b2 = lin(ks[2], ks[3], hidden_dim, hidden_dim)
    w3, b3 = lin(ks[4], ks[5], hidden_dim, output_dim)

    return dict(
        w1=w1, b1=b1,
        g1=jnp.ones((hidden_dim,), jnp.float32),
        be1=jnp.zeros((hidden_dim,), jnp.float32),
        a1=jnp.float32(0.25),
        w2=w2, b2=b2,
        g2=jnp.ones((hidden_dim,), jnp.float32),
        be2=jnp.zeros((hidden_dim,), jnp.float32),
        a2=jnp.float32(0.25),
        w3=w3, b3=b3,
    )


def dqn_reference(x, p, matmul_dtype=jnp.float32):
    """Pure-JAX reference (PyTorch training-mode forward). matmul_dtype=bf16 mirrors
    the kernel's MXU operand precision for a tight correctness check."""
    eps = 1e-5

    def block(h, w, b, g, be, a):
        h = jnp.dot(h.astype(matmul_dtype), w.astype(matmul_dtype),
                    preferred_element_type=jnp.float32) + b
        m = h.mean(0, keepdims=True)
        v = ((h - m) ** 2).mean(0, keepdims=True)
        h = (h - m) / jnp.sqrt(v + eps) * g + be
        return jnp.where(h > 0, h, a * h)

    h = block(x, p["w1"], p["b1"], p["g1"], p["be1"], p["a1"])
    h = block(h, p["w2"], p["b2"], p["g2"], p["be2"], p["a2"])
    return jnp.dot(h.astype(matmul_dtype), p["w3"].astype(matmul_dtype),
                   preferred_element_type=jnp.float32) + p["b3"]


if __name__ == "__main__":
    input_dim, hidden_dim, output_dim = 16, 32, 4

    key = jax.random.PRNGKey(0)
    kx, kp, kx2 = jax.random.split(key, 3)
    params = init_params(kp, input_dim, hidden_dim, output_dim)
    prep = prepare_params(params)   # one-time; not part of the per-call path

    # Case 1: B=8 (exercises the padded-batch + masked-BN-stats path).
    x = jax.random.normal(kx, (8, input_dim), jnp.float32)
    out = dqn_forward(x, prep)
    jax.block_until_ready(out)
    assert out.shape == (8, output_dim)
    ref_bf16 = dqn_reference(x, params, matmul_dtype=jnp.bfloat16)
    assert jnp.allclose(out, ref_bf16, atol=5e-3, rtol=5e-3), "B=8 mismatch vs bf16 ref"
    ref_f32 = dqn_reference(x, params, matmul_dtype=jnp.float32)
    assert jnp.allclose(out, ref_f32, atol=1e-1, rtol=1e-1), "B=8 mismatch vs f32 ref"

    # Case 2: B=16 (no batch padding, mask-free path).
    x2 = jax.random.normal(kx2, (16, input_dim), jnp.float32)
    out2 = dqn_forward(x2, prep)
    jax.block_until_ready(out2)
    assert out2.shape == (16, output_dim)
    ref2 = dqn_reference(x2, params, matmul_dtype=jnp.bfloat16)
    assert jnp.allclose(out2, ref2, atol=5e-3, rtol=5e-3), "B=16 mismatch vs bf16 ref"

    print("KERNEL_OK")
</pallas_src>

<mosaic_0001>
module attributes {stable_mosaic.version = 11 : i64} {
  func.func @dqn_kernel(%arg0: memref<16x16xf32, #tpu.memory_space<vmem>>, %arg1: memref<16x256xbf16, #tpu.memory_space<vmem>>, %arg2: memref<256x256xbf16, #tpu.memory_space<vmem>>, %arg3: memref<256x256xbf16, #tpu.memory_space<vmem>>, %arg4: memref<5x256xf32, #tpu.memory_space<vmem>>, %arg5: memref<2xf32, #tpu.memory_space<smem>>, %arg6: memref<16x256xf32, #tpu.memory_space<vmem>>) attributes {dimension_semantics = [], scalar_prefetch = 0 : i64, scratch_operands = 0 : i64, tpu.core_type = #tpu.core_type<tc>} {
    %0 = tpu.iota {dimensions = array<i32: 0>} : vector<16x1xi32>
    %c8_i32 = arith.constant 8 : i32
    %1 = vector.broadcast %c8_i32 : i32 to vector<16x1xi32>
    %2 = arith.cmpi slt, %0, %1 : vector<16x1xi32>
    %c0 = arith.constant 0 : index
    %c0_0 = arith.constant 0 : index
    %3 = vector.load %arg4[%c0, %c0_0] : memref<5x256xf32, #tpu.memory_space<vmem>>, vector<5x256xf32>
    %4 = vector.extract_strided_slice %3 {offsets = [0, 0], sizes = [1, 256], strides = [1, 1]} : vector<5x256xf32> to vector<1x256xf32>
    %5 = vector.extract_strided_slice %3 {offsets = [1, 0], sizes = [1, 256], strides = [1, 1]} : vector<5x256xf32> to vector<1x256xf32>
    %6 = vector.extract_strided_slice %3 {offsets = [2, 0], sizes = [1, 256], strides = [1, 1]} : vector<5x256xf32> to vector<1x256xf32>
    %7 = vector.extract_strided_slice %3 {offsets = [3, 0], sizes = [1, 256], strides = [1, 1]} : vector<5x256xf32> to vector<1x256xf32>
    %8 = vector.extract_strided_slice %3 {offsets = [4, 0], sizes = [1, 256], strides = [1, 1]} : vector<5x256xf32> to vector<1x256xf32>
    %c0_1 = arith.constant 0 : index
    %c0_2 = arith.constant 0 : index
    %9 = vector.load %arg0[%c0_1, %c0_2] : memref<16x16xf32, #tpu.memory_space<vmem>>, vector<16x16xf32>
    %10 = arith.truncf %9 : vector<16x16xf32> to vector<16x16xbf16>
    %c0_3 = arith.constant 0 : index
    %11 = memref.load %arg5[%c0_3] : memref<2xf32, #tpu.memory_space<smem>>
    %c0_4 = arith.constant 0 : index
    %c0_5 = arith.constant 0 : index
    %12 = vector.load %arg1[%c0_4, %c0_5] : memref<16x256xbf16, #tpu.memory_space<vmem>>, vector<16x256xbf16>
    %cst = arith.constant dense<0.000000e+00> : vector<16x256xf32>
    %13 = tpu.matmul %10, %12, %cst {dimension_numbers = #tpu.dot_dimension_numbers<[1], [0], [0], [1], [0, 0, 1, 1], [], []>} : vector<16x16xbf16>, vector<16x256xbf16>, vector<16x256xf32> -> vector<16x256xf32>
    %cst_6 = arith.constant 0.000000e+00 : f32
    %14 = vector.shape_cast %2 : vector<16x1xi1> to vector<16x1xi1>
    %15 = vector.broadcast %14 : vector<16x1xi1> to vector<16x256xi1>
    %16 = vector.broadcast %cst_6 : f32 to vector<16x256xf32>
    %17 = arith.select %15, %13, %16 : vector<16x256xi1>, vector<16x256xf32>
    %cst_7 = arith.constant dense<0.000000e+00> : vector<256xf32>
    %18 = vector.multi_reduction <add>, %17, %cst_7 [0] : vector<16x256xf32> to vector<256xf32>
    %19 = vector.shape_cast %18 : vector<256xf32> to vector<1x256xf32>
    %cst_8 = arith.constant 1.250000e-01 : f32
    %20 = vector.broadcast %cst_8 : f32 to vector<1x256xf32>
    %21 = arith.mulf %19, %20 : vector<1x256xf32>
    %22 = vector.broadcast %21 : vector<1x256xf32> to vector<16x256xf32>
    %23 = arith.subf %13, %22 : vector<16x256xf32>
    %24 = arith.mulf %23, %23 : vector<16x256xf32>
    %cst_9 = arith.constant 0.000000e+00 : f32
    %25 = vector.shape_cast %2 : vector<16x1xi1> to vector<16x1xi1>
    %26 = vector.broadcast %25 : vector<16x1xi1> to vector<16x256xi1>
    %27 = vector.broadcast %cst_9 : f32 to vector<16x256xf32>
    %28 = arith.select %26, %24, %27 : vector<16x256xi1>, vector<16x256xf32>
    %cst_10 = arith.constant dense<0.000000e+00> : vector<256xf32>
    %29 = vector.multi_reduction <add>, %28, %cst_10 [0] : vector<16x256xf32> to vector<256xf32>
    %30 = vector.shape_cast %29 : vector<256xf32> to vector<1x256xf32>
    %cst_11 = arith.constant 1.250000e-01 : f32
    %31 = vector.broadcast %cst_11 : f32 to vector<1x256xf32>
    %32 = arith.mulf %30, %31 : vector<1x256xf32>
    %cst_12 = arith.constant 9.99999974E-6 : f32
    %33 = vector.broadcast %cst_12 : f32 to vector<1x256xf32>
    %34 = arith.addf %32, %33 : vector<1x256xf32>
    %35 = math.rsqrt %34 : vector<1x256xf32>
    %36 = arith.mulf %4, %35 : vector<1x256xf32>
    %37 = vector.broadcast %36 : vector<1x256xf32> to vector<16x256xf32>
    %38 = arith.mulf %23, %37 : vector<16x256xf32>
    %39 = vector.broadcast %5 : vector<1x256xf32> to vector<16x256xf32>
    %40 = arith.addf %38, %39 : vector<16x256xf32>
    %cst_13 = arith.constant 0.000000e+00 : f32
    %41 = vector.broadcast %cst_13 : f32 to vector<16x256xf32>
    %42 = arith.cmpf ogt, %40, %41 : vector<16x256xf32>
    %43 = vector.broadcast %11 : f32 to vector<16x256xf32>
    %44 = arith.mulf %43, %40 : vector<16x256xf32>
    %45 = arith.select %42, %40, %44 : vector<16x256xi1>, vector<16x256xf32>
    %46 = arith.truncf %45 : vector<16x256xf32> to vector<16x256xbf16>
    %c1 = arith.constant 1 : index
    %47 = memref.load %arg5[%c1] : memref<2xf32, #tpu.memory_space<smem>>
    %c0_14 = arith.constant 0 : index
    %c0_15 = arith.constant 0 : index
    %48 = vector.load %arg2[%c0_14, %c0_15] : memref<256x256xbf16, #tpu.memory_space<vmem>>, vector<256x256xbf16>
    %cst_16 = arith.constant dense<0.000000e+00> : vector<16x256xf32>
    %49 = tpu.matmul %46, %48, %cst_16 {dimension_numbers = #tpu.dot_dimension_numbers<[1], [0], [0], [1], [0, 0, 1, 1], [], []>} : vector<16x256xbf16>, vector<256x256xbf16>, vector<16x256xf32> -> vector<16x256xf32>
    %cst_17 = arith.constant 0.000000e+00 : f32
    %50 = vector.shape_cast %2 : vector<16x1xi1> to vector<16x1xi1>
    %51 = vector.broadcast %50 : vector<16x1xi1> to vector<16x256xi1>
    %52 = vector.broadcast %cst_17 : f32 to vector<16x256xf32>
    %53 = arith.select %51, %49, %52 : vector<16x256xi1>, vector<16x256xf32>
    %cst_18 = arith.constant dense<0.000000e+00> : vector<256xf32>
    %54 = vector.multi_reduction <add>, %53, %cst_18 [0] : vector<16x256xf32> to vector<256xf32>
    %55 = vector.shape_cast %54 : vector<256xf32> to vector<1x256xf32>
    %cst_19 = arith.constant 1.250000e-01 : f32
    %56 = vector.broadcast %cst_19 : f32 to vector<1x256xf32>
    %57 = arith.mulf %55, %56 : vector<1x256xf32>
    %58 = vector.broadcast %57 : vector<1x256xf32> to vector<16x256xf32>
    %59 = arith.subf %49, %58 : vector<16x256xf32>
    %60 = arith.mulf %59, %59 : vector<16x256xf32>
    %cst_20 = arith.constant 0.000000e+00 : f32
    %61 = vector.shape_cast %2 : vector<16x1xi1> to vector<16x1xi1>
    %62 = vector.broadcast %61 : vector<16x1xi1> to vector<16x256xi1>
    %63 = vector.broadcast %cst_20 : f32 to vector<16x256xf32>
    %64 = arith.select %62, %60, %63 : vector<16x256xi1>, vector<16x256xf32>
    %cst_21 = arith.constant dense<0.000000e+00> : vector<256xf32>
    %65 = vector.multi_reduction <add>, %64, %cst_21 [0] : vector<16x256xf32> to vector<256xf32>
    %66 = vector.shape_cast %65 : vector<256xf32> to vector<1x256xf32>
    %cst_22 = arith.constant 1.250000e-01 : f32
    %67 = vector.broadcast %cst_22 : f32 to vector<1x256xf32>
    %68 = arith.mulf %66, %67 : vector<1x256xf32>
    %cst_23 = arith.constant 9.99999974E-6 : f32
    %69 = vector.broadcast %cst_23 : f32 to vector<1x256xf32>
    %70 = arith.addf %68, %69 : vector<1x256xf32>
    %71 = math.rsqrt %70 : vector<1x256xf32>
    %72 = arith.mulf %6, %71 : vector<1x256xf32>
    %73 = vector.broadcast %72 : vector<1x256xf32> to vector<16x256xf32>
    %74 = arith.mulf %59, %73 : vector<16x256xf32>
    %75 = vector.broadcast %7 : vector<1x256xf32> to vector<16x256xf32>
    %76 = arith.addf %74, %75 : vector<16x256xf32>
    %cst_24 = arith.constant 0.000000e+00 : f32
    %77 = vector.broadcast %cst_24 : f32 to vector<16x256xf32>
    %78 = arith.cmpf ogt, %76, %77 : vector<16x256xf32>
    %79 = vector.broadcast %47 : f32 to vector<16x256xf32>
    %80 = arith.mulf %79, %76 : vector<16x256xf32>
    %81 = arith.select %78, %76, %80 : vector<16x256xi1>, vector<16x256xf32>
    %82 = arith.truncf %81 : vector<16x256xf32> to vector<16x256xbf16>
    %c0_25 = arith.constant 0 : index
    %c0_26 = arith.constant 0 : index
    %83 = vector.load %arg3[%c0_25, %c0_26] : memref<256x256xbf16, #tpu.memory_space<vmem>>, vector<256x256xbf16>
    %cst_27 = arith.constant dense<0.000000e+00> : vector<16x256xf32>
    %84 = tpu.matmul %82, %83, %cst_27 {dimension_numbers = #tpu.dot_dimension_numbers<[1], [0], [0], [1], [0, 0, 1, 1], [], []>} : vector<16x256xbf16>, vector<256x256xbf16>, vector<16x256xf32> -> vector<16x256xf32>
    %85 = vector.broadcast %8 : vector<1x256xf32> to vector<16x256xf32>
    %86 = arith.addf %84, %85 : vector<16x256xf32>
    %c0_28 = arith.constant 0 : index
    %c0_29 = arith.constant 0 : index
    %87 = vector.load %arg6[%c0_28, %c0_29] : memref<16x256xf32, #tpu.memory_space<vmem>>, vector<16x256xf32>
    tpu.vector_store %arg6[%c0_28, %c0_29], %86 {strides = array<i32>} : memref<16x256xf32, #tpu.memory_space<vmem>>, vector<16x256xf32>,
    return
  }
}

</mosaic_0001>

<bundles_post_ra>
// kernel: _dqn_forward_impl.1
= control target key start
LH: loop header
LB: loop body
LE: loop exit
PB: predicated region body
PF: predicated region fallthrough
CT: control target
= control target key end

     0   :  { %11 = vsyncpa [#allocation3], 0  ;;  %s1155_s0 = inlined_call_operand.vmem [shape: f32[16,16], index: 0, kind: input, shape index: {}]   ;;  %s1156_s1 = inlined_call_operand.vmem [shape: bf16[16,256], index: 1, kind: input, shape index: {}]   ;;  %s1157_s2 = inlined_call_operand.hbm [shape: bf16[256,256], index: 2, kind: input, shape index: {}]   ;;  %s1158_s3 = inlined_call_operand.hbm [shape: bf16[256,256], index: 3, kind: input, shape index: {}]   ;;  %s1159_s4 = inlined_call_operand.vmem [shape: f32[5,256], index: 4, kind: input, shape index: {}]   ;;  %s1160_s5 = inlined_call_operand.vmem [shape: f32[2], index: 5, kind: input, shape index: {}]   ;;  %s1161_s6 = inlined_call_operand.vmem [shape: f32[16,256], index: 6, kind: output, shape index: {}]  }
   0x1   :  { %12 = vsyncpa [#allocation6], 0 }
   0x2   :  { %13 = vsyncpa [#allocation4], 0  ;;  %s1054_s21 = smov [#allocation2]  }
   0x3   :  { %s23_s22 = sshll.u32 %s1054_s21, 4  ;;  %s24_s22 = int_to_ptr.vmem [resolvable:$true] %s23_s22 }
   0x4   :  { %s1004_s23 = scalar_lea.vmem %s24_s22, 4096  ;;  %p1009_p1 = scmp.lt.s32.totalorder %s24_s22, %s24_s22 }
   0x5   :  { %p1005_p0 = scmp.ne.s32.totalorder %s24_s22, %s1004_s23  ;;  %p1010_p2 = scmp.lt.s32.totalorder %s1004_s23, %s1004_s23 }
   0x7   :  { %p1011_p3 = por %p1010_p2, %p1009_p1 }
   0x9   :  { %p1012_p4 = pnand %p1011_p3, %p1005_p0 }
   0xb   :  { %1015 = shalt.err (!%p1012_p4)
}
   0xc   :  { %s1055_s24 = smov 128   ;;  %s1056_s25 = smov 8  }
   0xd   :  { %29 = dma.hbm_to_vmem [thread:$0]  %s1157_s2, 4096, %s24_s22, [#allocation3], %s1055_s24, %s1055_s24, %s1056_s25  }
   0xe   :  { %s1057_s28 = smov [#allocation5]   ;;  %s50_s8 = sshll.u32 %s1160_s5, 4  ;;  %s51_s8 = int_to_ptr.vmem [resolvable:$true] %s50_s8 }
   0xf   :  { %s35_s29 = sshll.u32 %s1057_s28, 4  ;;  %s36_s29 = int_to_ptr.vmem [resolvable:$true] %s35_s29 }
  0x10   :  { %s1024_s9 = scalar_lea.vmem %s36_s29, 4096  ;;  %p1029_p6 = scmp.lt.s32.totalorder %s36_s29, %s36_s29 }
  0x11   :  { %p1025_p5 = scmp.ne.s32.totalorder %s36_s29, %s1024_s9  ;;  %p1030_p7 = scmp.lt.s32.totalorder %s1024_s9, %s1024_s9 }
  0x13   :  { %p1031_p8 = por %p1030_p7, %p1029_p6 }
  0x15   :  { %p1032_p9 = pnand %p1031_p8, %p1025_p5 }
  0x17   :  { %1035 = shalt.err (!%p1032_p9)
}
  0x18   :  { %41 = dma.hbm_to_vmem [thread:$0]  %s1158_s3, 4096, %s36_s29, [#allocation6], %s1055_s24, %s1055_s24, %s1056_s25  }
  0x19   :  { %s1036_s2 = scalar_lea.vmem %s51_s8, 16  ;;  %p1041_p11 = scmp.lt.s32.totalorder %s51_s8, %s51_s8 }
  0x1a   :  { %p1037_p10 = scmp.ne.s32.totalorder %s51_s8, %s1036_s2  ;;  %p1042_p12 = scmp.lt.s32.totalorder %s1036_s2, %s1036_s2 }
  0x1c   :  { %p1043_p13 = por %p1042_p12, %p1041_p11 }
  0x1e   :  { %p1044_p0 = pnand %p1043_p13, %p1037_p10 }
  0x20   :  { %1047 = shalt.err (!%p1044_p0)
}
  0x21   :  { %s1058_s5 = smov [#allocation7]  }
  0x22   :  { %53 = dma.vmem_to_smem %s51_s8, 16, %s1058_s5, [#allocation4]  }
  0x23   :  { %1048 = dma.done.wait [#allocation3], 4096  }
  0x24   :  { %1049 = vsyncadd [#allocation3], 4294963200 }
  0x25   :  { %1050 = dma.done.wait [#allocation6], 4096  }
  0x26   :  { %1051 = vsyncadd [#allocation6], 4294963200 }
  0x27   :  { %1052 = dma.done.wait [#allocation4], 16  }
  0x28   :  { %1053 = vsyncadd [#allocation4], 4294967280 }
  0x29   :  { %63 = sfence }
  0x2a   :  { %v889_v0 = vld [vmem:[%s1156_s1 + $0x4] ss:$8 sps:$4 sm:$0xff]   ;;  %v891_v1 = vld [vmem:[%s1156_s1] ss:$8 sps:$4 sm:$0xff]   ;;  %v1059_v2 = vmov 0   ;;  %vm88_vm0 = vcmask 130048  }
  0x2b   :  { %124 = vmatprep.mubr.bf16.mxu0 %v1059_v2  ;;  %v72_v3 = vld [vmem:[%s1155_s0] sm:$0xff]  ;;  %v73_v4 = vld [vmem:[%s1155_s0 + $0x8] sm:$0xff]  ;;  %106 = vmatprep.subr.bf16.mxu0 %v889_v0  ;;  %v892_v6 = vld [vmem:[#allocation2 + $0x74] ss:$8 sps:$4 sm:$0xff]   ;;  %s75_s19 = sld [smem:[#allocation7]] }
  0x2c   :  { %v74_v5 = vpack.c.bf16 %v73_v4, %v72_v3  ;;  %107 = vmatpush1.bf16.msra.mxu0 %v891_v1  ;;  %v894_v7 = vld [vmem:[#allocation2 + $0x70] ss:$8 sps:$4 sm:$0xff]   ;;  %425 = vmatprep.subr.bf16.mxu1 %v892_v6  ;;  %v895_v8 = vld [vmem:[#allocation2 + $0x64] ss:$8 sps:$4 sm:$0xff]   ;;  %v897_v9 = vld [vmem:[#allocation2 + $0x60] ss:$8 sps:$4 sm:$0xff]  }
  0x2d   :  { %426 = vmatpush1.bf16.msra.mxu1 %v894_v7  ;;  %v898_v10 = vld [vmem:[#allocation2 + $0x54] ss:$8 sps:$4 sm:$0xff]   ;;  %v900_v11 = vld [vmem:[#allocation2 + $0x50] ss:$8 sps:$4 sm:$0xff]   ;;  %v901_v12 = vld [vmem:[#allocation2 + $0x44] ss:$8 sps:$4 sm:$0xff]  }
  0x2e   :  { %427 = vmatprep.subr.bf16.mxu1 %v895_v8  ;;  %v903_v13 = vld [vmem:[#allocation2 + $0x40] ss:$8 sps:$4 sm:$0xff]   ;;  %v904_v14 = vld [vmem:[#allocation2 + $0x34] ss:$8 sps:$4 sm:$0xff]   ;;  %v906_v15 = vld [vmem:[#allocation2 + $0x30] ss:$8 sps:$4 sm:$0xff]  }
  0x2f   :  { %817 = vmatmul.mubr.msk.bf16.vlgmr.msra.gmra.mxu0 %vm88_vm0, %v74_v5  ;;  %v907_v16 = vld [vmem:[#allocation2 + $0x24] ss:$8 sps:$4 sm:$0xff]   ;;  %v909_v17 = vld [vmem:[#allocation2 + $0x20] ss:$8 sps:$4 sm:$0xff]   ;;  %v910_v18 = vld [vmem:[#allocation2 + $0x14] ss:$8 sps:$4 sm:$0xff]  }
  0x30   :  { %v912_v19 = vld [vmem:[#allocation2 + $0x10] ss:$8 sps:$4 sm:$0xff]   ;;  %v913_v20 = vld [vmem:[#allocation2 + $0x4] ss:$8 sps:$4 sm:$0xff]   ;;  %v915_v21 = vld [vmem:[#allocation2] ss:$8 sps:$4 sm:$0xff]  }
  0x31   :  { %428 = vmatpush1.bf16.msra.mxu1 %v897_v9  ;;  %v916_v22 = vld [vmem:[#allocation2 + $0xf4] ss:$8 sps:$4 sm:$0xff]   ;;  %v918_v23 = vld [vmem:[#allocation2 + $0xf0] ss:$8 sps:$4 sm:$0xff]   ;;  %v919_v24 = vld [vmem:[#allocation2 + $0xe4] ss:$8 sps:$4 sm:$0xff]  }
  0x32   :  { %429 = vmatprep.subr.bf16.mxu1 %v898_v10  ;;  %v921_v25 = vld [vmem:[#allocation2 + $0xe0] ss:$8 sps:$4 sm:$0xff]   ;;  %v922_v26 = vld [vmem:[#allocation2 + $0xd4] ss:$8 sps:$4 sm:$0xff]   ;;  %v924_v27 = vld [vmem:[#allocation2 + $0xd0] ss:$8 sps:$4 sm:$0xff]   ;;  %v193_v10 = vlaneseq }
  0x33   :  { %v925_v28 = vld [vmem:[#allocation2 + $0xc4] ss:$8 sps:$4 sm:$0xff]   ;;  %v927_v29 = vld [vmem:[#allocation2 + $0xc0] ss:$8 sps:$4 sm:$0xff]   ;;  %v928_v30 = vld [vmem:[#allocation2 + $0xb4] ss:$8 sps:$4 sm:$0xff]  }
  0x34   :  { %v930_v31 = vld [vmem:[#allocation2 + $0xb0] ss:$8 sps:$4 sm:$0xff]   ;;  %v931_v32 = vld [vmem:[#allocation2 + $0xa4] ss:$8 sps:$4 sm:$0xff]   ;;  %v933_v33 = vld [vmem:[#allocation2 + $0xa0] ss:$8 sps:$4 sm:$0xff]  }
  0x35   :  { %430 = vmatpush1.bf16.msra.mxu1 %v900_v11  ;;  %v934_v34 = vld [vmem:[#allocation2 + $0x94] ss:$8 sps:$4 sm:$0xff]   ;;  %v936_v35 = vld [vmem:[#allocation2 + $0x90] ss:$8 sps:$4 sm:$0xff]   ;;  %v937_v36 = vld [vmem:[#allocation2 + $0x84] ss:$8 sps:$4 sm:$0xff]  }
  0x36   :  { %431 = vmatprep.subr.bf16.mxu1 %v901_v12  ;;  %v939_v37 = vld [vmem:[#allocation2 + $0x80] ss:$8 sps:$4 sm:$0xff]   ;;  %v1116_v11 = vshrl.u32 %v193_v10, 7 }
  0x37   :  { %v1121_v12 = vld [vmem:[%s1159_s4] sm:$0x1f] }
  0x38   :  { %v979_v10 = vld [vmem:[#allocation5 + $0xa0] ss:$8 sps:$4 sm:$0xff]  }
  0x39   :  { %432 = vmatpush1.bf16.msra.mxu1 %v903_v13  ;;  %v195_v13 = vsub.s32 0, %v1116_v11 }
  0x3a   :  { %433 = vmatprep.subr.bf16.mxu1 %v904_v14  ;;  %v207_v14 = vsub.s32 1, %v1116_v11 }
  0x3d   :  { %434 = vmatpush1.bf16.msra.mxu1 %v906_v15 }
  0x3e   :  { %435 = vmatprep.subr.bf16.mxu1 %v907_v16 }
  0x41   :  { %436 = vmatpush1.bf16.msra.mxu1 %v909_v17  ;;  %v1128_v17 = vld [vmem:[%s1159_s4 + $0x8] sm:$0x1f]  ;;  %s818_s4 = sld [smem:[#allocation7 + $0x1]] }
  0x42   :  { %437 = vmatprep.subr.bf16.mxu1 %v910_v18 }
  0x45   :  { %438 = vmatpush1.bf16.msra.mxu1 %v912_v19 }
  0x46   :  { %439 = vmatprep.subr.bf16.mxu1 %v913_v20 }
  0x49   :  { %440 = vmatpush1.bf16.msra.mxu1 %v915_v21 }
  0x4a   :  { %441 = vmatprep.subr.bf16.mxu1 %v916_v22  ;;  %v208_v22 = vrot.slane %v1121_v12, %v207_v14 }
  0x4d   :  { %442 = vmatpush2.bf16.msra.mxu1 %v918_v23 }
  0x4e   :  { %443 = vmatprep.subr.bf16.mxu1 %v919_v24 }
  0x51   :  { %444 = vmatpush2.bf16.msra.mxu1 %v921_v25  ;;  %v212_v25 = vrot.slane %v1128_v17, %v207_v14  ;;  %v982_v14 = vld [vmem:[#allocation5 + $0x90] ss:$8 sps:$4 sm:$0xff]  }
  0x52   :  { %445 = vmatprep.subr.bf16.mxu1 %v922_v26 }
  0x55   :  { %446 = vmatpush2.bf16.msra.mxu1 %v924_v27 }
  0x56   :  { %447 = vmatprep.subr.bf16.mxu1 %v925_v28 }
  0x59   :  { %448 = vmatpush2.bf16.msra.mxu1 %v927_v29 }
  0x5a   :  { %449 = vmatprep.subr.bf16.mxu1 %v928_v30  ;;  %v221_v30 = vstv %s75_s19 }
  0x5d   :  { %450 = vmatpush2.bf16.msra.mxu1 %v930_v31 }
  0x5e   :  { %451 = vmatprep.subr.bf16.mxu1 %v931_v32 }
  0x61   :  { %452 = vmatpush2.bf16.msra.mxu1 %v933_v33 }
  0x62   :  { %453 = vmatprep.subr.bf16.mxu1 %v934_v34 }
  0x65   :  { %454 = vmatpush2.bf16.msra.mxu1 %v936_v35 }
  0x66   :  { %455 = vmatprep.subr.bf16.mxu1 %v937_v36 }
  0x69   :  { %456 = vmatpush2.bf16.msra.mxu1 %v939_v37 }
  0xef   :  { %v126_v38 = vpop.f32.mrf.mxu0 }
  0xf0   :  { %v144_v39 = vrot.slane %v126_v38, 4 }
  0xf1   :  { %v128_v40 = vpop.f32.mrf.mxu0 }
  0xf2   :  { %v145_v41 = vadd.f32 %v144_v39, %v126_v38  ;;  %v151_v42 = vrot.slane %v128_v40, 4 }
  0xf3   :  { %v130_v16 = vpop.f32.mrf.mxu0 }
  0xf4   :  { %v146_v43 = vrot.slane %v145_v41, 2  ;;  %v152_v44 = vadd.f32 %v151_v42, %v128_v40 }
  0xf5   :  { %v132_v24 = vpop.f32.mrf.mxu0 }
  0xf6   :  { %v153_v45 = vrot.slane %v152_v44, 2  ;;  %v147_v46 = vadd.f32 %v146_v43, %v145_v41 }
  0xf8   :  { %v148_v47 = vrot.slane %v147_v46, 1  ;;  %v154_v48 = vadd.f32 %v153_v45, %v152_v44 }
  0xfa   :  { %v149_v49 = vadd.f32 %v148_v47, %v147_v46  ;;  %v155_v50 = vrot.slane %v154_v48, 1  ;;  %v942_v47 = vld [vmem:[#allocation5 + $0x74] ss:$8 sps:$4 sm:$0xff]  }
  0xfb   :  { %761 = vmatprep.subr.bf16.mxu0 %v942_v47 }
  0xfc   :  { %v157_v51 = vmul.f32 0.125, %v149_v49  ;;  %v156_v52 = vadd.f32 %v155_v50, %v154_v48  ;;  %v940_v48 = vld [vmem:[#allocation5 + $0x70] ss:$8 sps:$4 sm:$0xff]   ;;  %v945_v49 = vld [vmem:[#allocation5 + $0x64] ss:$8 sps:$4 sm:$0xff]  }
  0xfd   :  { %762 = vmatpush1.bf16.msra.mxu0 %v940_v48  ;;  %v943_v50 = vld [vmem:[#allocation5 + $0x60] ss:$8 sps:$4 sm:$0xff]  }
  0xfe   :  { %v159_v53 = vsub.f32 %v126_v38, %v157_v51  ;;  %v158_v54 = vmul.f32 0.125, %v156_v52  ;;  %v161_v20 = vsub.f32 %v130_v16, %v157_v51  ;;  %763 = vmatprep.subr.bf16.mxu0 %v945_v49  ;;  %v948_v51 = vld [vmem:[#allocation5 + $0x54] ss:$8 sps:$4 sm:$0xff]   ;;  %v946_v52 = vld [vmem:[#allocation5 + $0x50] ss:$8 sps:$4 sm:$0xff]  }
  0xff   :  { %v987_v16 = vld [vmem:[#allocation5 + $0x84] ss:$8 sps:$4 sm:$0xff]  }
 0x100   :  { %v163_v55 = vmul.f32 %v159_v53, %v159_v53  ;;  %v160_v56 = vsub.f32 %v128_v40, %v158_v54  ;;  %v162_v28 = vsub.f32 %v132_v24, %v158_v54  ;;  %v949_v54 = vld [vmem:[#allocation5 + $0x40] ss:$8 sps:$4 sm:$0xff]  }
 0x101   :  { %764 = vmatpush1.bf16.msra.mxu0 %v943_v50 }
 0x102   :  { %v172_v57 = vrot.slane %v163_v55, 4  ;;  %v164_v58 = vmul.f32 %v160_v56, %v160_v56  ;;  %765 = vmatprep.subr.bf16.mxu0 %v948_v51 }
 0x104   :  { %v173_v59 = vadd.f32 %v172_v57, %v163_v55  ;;  %v179_v60 = vrot.slane %v164_v58, 4  ;;  %v954_v55 = vld [vmem:[#allocation5 + $0x34] ss:$8 sps:$4 sm:$0xff]   ;;  %v957_v57 = vld [vmem:[#allocation5 + $0x24] ss:$8 sps:$4 sm:$0xff]  }
 0x105   :  { %766 = vmatpush1.bf16.msra.mxu0 %v946_v52 }
 0x106   :  { %v174_v61 = vrot.slane %v173_v59, 2  ;;  %v180_v62 = vadd.f32 %v179_v60, %v164_v58  ;;  %v955_v58 = vld [vmem:[#allocation5 + $0x20] ss:$8 sps:$4 sm:$0xff]   ;;  %v958_v60 = vld [vmem:[#allocation5 + $0x10] ss:$8 sps:$4 sm:$0xff]  }
 0x108   :  { %v175_v63 = vadd.f32 %v174_v61, %v173_v59  ;;  %v181_v0 = vrot.slane %v180_v62, 2  ;;  %v960_v59 = vld [vmem:[#allocation5 + $0x14] ss:$8 sps:$4 sm:$0xff]   ;;  %v963_v61 = vld [vmem:[#allocation5 + $0x4] ss:$8 sps:$4 sm:$0xff]  }
 0x10a   :  { %v176_v1 = vrot.slane %v175_v63, 1  ;;  %v182_v2 = vadd.f32 %v181_v0, %v180_v62  ;;  %v961_v62 = vld [vmem:[#allocation5] ss:$8 sps:$4 sm:$0xff]   ;;  %v964_v0 = vld [vmem:[#allocation5 + $0xf0] ss:$8 sps:$4 sm:$0xff]  }
 0x10c   :  { %v177_v3 = vadd.f32 %v176_v1, %v175_v63  ;;  %v183_v4 = vrot.slane %v182_v2, 1  ;;  %v966_v63 = vld [vmem:[#allocation5 + $0xf4] ss:$8 sps:$4 sm:$0xff]   ;;  %v969_v1 = vld [vmem:[#allocation5 + $0xe4] ss:$8 sps:$4 sm:$0xff]  }
 0x10e   :  { %v185_v5 = vmul.f32 0.125, %v177_v3  ;;  %v184_v6 = vadd.f32 %v183_v4, %v182_v2  ;;  %v967_v2 = vld [vmem:[#allocation5 + $0xe0] ss:$8 sps:$4 sm:$0xff]   ;;  %v972_v3 = vld [vmem:[#allocation5 + $0xd4] ss:$8 sps:$4 sm:$0xff]  }
 0x10f   :  { %v970_v4 = vld [vmem:[#allocation5 + $0xd0] ss:$8 sps:$4 sm:$0xff]  }
 0x110   :  { %v187_v7 = vadd.f32 1e-05, %v185_v5  ;;  %v186_v8 = vmul.f32 0.125, %v184_v6  ;;  %v975_v5 = vld [vmem:[#allocation5 + $0xc4] ss:$8 sps:$4 sm:$0xff]  }
 0x111   :  { %v973_v6 = vld [vmem:[#allocation5 + $0xc0] ss:$8 sps:$4 sm:$0xff]  }
 0x112   :  { %988 = vrsqrt.f32 %v187_v7  ;;  %v188_v9 = vadd.f32 1e-05, %v186_v8  ;;  %v978_v7 = vld [vmem:[#allocation5 + $0xb4] ss:$8 sps:$4 sm:$0xff]   ;;  %v976_v8 = vld [vmem:[#allocation5 + $0xb0] ss:$8 sps:$4 sm:$0xff]  }
 0x114   :  { %990 = vrsqrt.f32 %v188_v9  ;;  %v981_v9 = vld [vmem:[#allocation5 + $0xa4] ss:$8 sps:$4 sm:$0xff]  }
 0x11f   :  { %v989_v15 = vpop.eup %988 }
 0x120   :  { %v191_v18 = vmul.f32 %v989_v15, %v1121_v12  ;;  %v985_v15 = vld [vmem:[#allocation5 + $0x80] ss:$8 sps:$4 sm:$0xff]  }
 0x121   :  { %v991_v19 = vpop.eup %990 }
 0x122   :  { %v196_v21 = vrot.slane %v191_v18, %v195_v13  ;;  %v192_v23 = vmul.f32 %v991_v19, %v1128_v17 }
 0x124   :  { %v201_v26 = vmul.f32 %v196_v21, %v159_v53  ;;  %v203_v27 = vmul.f32 %v196_v21, %v161_v20  ;;  %v200_v29 = vrot.slane %v192_v23, %v195_v13  ;;  %v951_v53 = vld [vmem:[#allocation5 + $0x44] ss:$8 sps:$4 sm:$0xff]   ;;  %v984_v13 = vld [vmem:[#allocation5 + $0x94] ss:$8 sps:$4 sm:$0xff]  }
 0x125   :  { %767 = vmatprep.subr.bf16.mxu0 %v951_v53 }
 0x126   :  { %v213_v31 = vadd.f32 %v208_v22, %v201_v26  ;;  %v215_v32 = vadd.f32 %v208_v22, %v203_v27  ;;  %v202_v33 = vmul.f32 %v200_v29, %v160_v56  ;;  %v204_v34 = vmul.f32 %v200_v29, %v162_v28  ;;  %768 = vmatpush1.bf16.msra.mxu0 %v949_v54  ;;  %v952_v56 = vld [vmem:[#allocation5 + $0x30] ss:$8 sps:$4 sm:$0xff]  }
 0x127   :  { %769 = vmatprep.subr.bf16.mxu0 %v954_v55  ;;  %v524_v54 = vsub.s32 2, %v1116_v11  ;;  %v536_v55 = vsub.s32 3, %v1116_v11 }
 0x128   :  { %v224_v35 = vmul.f32 %v221_v30, %v215_v32  ;;  %v216_v36 = vadd.f32 %v212_v25, %v204_v34  ;;  %v214_v37 = vadd.f32 %v212_v25, %v202_v33  ;;  %vm217_vm1 = vcmp.gt.f32.partialorder %v213_v31, 0.0 }
 0x129   :  { %vm219_vm2 = vcmp.gt.f32.partialorder %v215_v32, 0.0  ;;  %v222_v38 = vmul.f32 %v221_v30, %v213_v31 }
 0x12a   :  { %vm218_vm3 = vcmp.gt.f32.partialorder %v214_v37, 0.0  ;;  %vm220_vm4 = vcmp.gt.f32.partialorder %v216_v36, 0.0  ;;  %v223_v39 = vmul.f32 %v221_v30, %v214_v37  ;;  %v225_v40 = vmul.f32 %v221_v30, %v216_v36  ;;  %770 = vmatpush1.bf16.msra.mxu0 %v952_v56 }
 0x12b   :  { %v226_v41 = vsel %vm217_vm1, %v213_v31, %v222_v38  ;;  %v228_v42 = vsel %vm219_vm2, %v215_v32, %v224_v35  ;;  %771 = vmatprep.subr.bf16.mxu0 %v957_v57 }
 0x12c   :  { %v227_v43 = vsel %vm218_vm3, %v214_v37, %v223_v39  ;;  %v229_v44 = vsel %vm220_vm4, %v216_v36, %v225_v40  ;;  %v230_v46 = vpack.c.bf16 %v228_v42, %v226_v41 }
 0x12d   :  { %v231_v45 = vpack.c.bf16 %v229_v44, %v227_v43 }
 0x12e   :  { %772 = vmatpush1.bf16.msra.mxu0 %v955_v58 }
 0x12f   :  { %457 = vmatprep.mubr.bf16.mxu1 %v231_v45  ;;  %773 = vmatprep.subr.bf16.mxu0 %v960_v59 }
 0x130   :  { %458 = vmatmul.mubr.bf16.vlgmr.msra.gmra.mxu1 %v230_v46 }
 0x132   :  { %774 = vmatpush1.bf16.msra.mxu0 %v958_v60 }
 0x133   :  { %775 = vmatprep.subr.bf16.mxu0 %v963_v61 }
 0x136   :  { %776 = vmatpush1.bf16.msra.mxu0 %v961_v62  ;;  %v537_v62 = vrot.slane %v1121_v12, %v536_v55 }
 0x137   :  { %777 = vmatprep.subr.bf16.mxu0 %v966_v63 }
 0x13a   :  { %778 = vmatpush2.bf16.msra.mxu0 %v964_v0 }
 0x13b   :  { %779 = vmatprep.subr.bf16.mxu0 %v969_v1  ;;  %v541_v1 = vrot.slane %v1128_v17, %v536_v55 }
 0x13e   :  { %780 = vmatpush2.bf16.msra.mxu0 %v967_v2 }
 0x13f   :  { %781 = vmatprep.subr.bf16.mxu0 %v972_v3 }
 0x142   :  { %782 = vmatpush2.bf16.msra.mxu0 %v970_v4 }
 0x143   :  { %783 = vmatprep.subr.bf16.mxu0 %v975_v5 }
 0x146   :  { %784 = vmatpush2.bf16.msra.mxu0 %v973_v6  ;;  %v550_v6 = vstv %s818_s4 }
 0x147   :  { %785 = vmatprep.subr.bf16.mxu0 %v978_v7 }
 0x14a   :  { %786 = vmatpush2.bf16.msra.mxu0 %v976_v8 }
 0x14b   :  { %787 = vmatprep.subr.bf16.mxu0 %v981_v9 }
 0x14e   :  { %788 = vmatpush2.bf16.msra.mxu0 %v979_v10 }
 0x14f   :  { %789 = vmatprep.subr.bf16.mxu0 %v984_v13 }
 0x152   :  { %790 = vmatpush2.bf16.msra.mxu0 %v982_v14 }
 0x153   :  { %791 = vmatprep.subr.bf16.mxu0 %v987_v16 }
 0x156   :  { %792 = vmatpush2.bf16.msra.mxu0 %v985_v15 }
 0x1f0   :  { %v459_v18 = vpop.f32.mrf.mxu1 }
 0x1f1   :  { %v473_v19 = vrot.slane %v459_v18, 4 }
 0x1f2   :  { %v461_v20 = vpop.f32.mrf.mxu1 }
 0x1f3   :  { %v474_v21 = vadd.f32 %v473_v19, %v459_v18  ;;  %v480_v22 = vrot.slane %v461_v20, 4 }
 0x1f4   :  { %v463_v57 = vpop.f32.mrf.mxu1 }
 0x1f5   :  { %v475_v23 = vrot.slane %v474_v21, 2  ;;  %v481_v24 = vadd.f32 %v480_v22, %v461_v20 }
 0x1f6   :  { %v465_v0 = vpop.f32.mrf.mxu1 }
 0x1f7   :  { %v482_v25 = vrot.slane %v481_v24, 2  ;;  %v476_v26 = vadd.f32 %v475_v23, %v474_v21 }
 0x1f9   :  { %v477_v27 = vrot.slane %v476_v26, 1  ;;  %v483_v28 = vadd.f32 %v482_v25, %v481_v24 }
 0x1fb   :  { %v478_v29 = vadd.f32 %v477_v27, %v476_v26  ;;  %v484_v30 = vrot.slane %v483_v28, 1  ;;  %v595_v26 = vsub.s32 4, %v1116_v11 }
 0x1fd   :  { %v486_v31 = vmul.f32 0.125, %v478_v29  ;;  %v485_v32 = vadd.f32 %v484_v30, %v483_v28  ;;  %v596_v27 = vrot.slane %v1121_v12, %v595_v26  ;;  %v600_v28 = vrot.slane %v1128_v17, %v595_v26 }
 0x1ff   :  { %v488_v33 = vsub.f32 %v459_v18, %v486_v31  ;;  %v487_v34 = vmul.f32 0.125, %v485_v32  ;;  %v490_v60 = vsub.f32 %v463_v57, %v486_v31 }
 0x201   :  { %v492_v35 = vmul.f32 %v488_v33, %v488_v33  ;;  %v489_v36 = vsub.f32 %v461_v20, %v487_v34  ;;  %v491_v4 = vsub.f32 %v465_v0, %v487_v34 }
 0x203   :  { %v501_v37 = vrot.slane %v492_v35, 4  ;;  %v493_v38 = vmul.f32 %v489_v36, %v489_v36 }
 0x205   :  { %v502_v39 = vadd.f32 %v501_v37, %v492_v35  ;;  %v508_v40 = vrot.slane %v493_v38, 4 }
 0x207   :  { %v503_v41 = vrot.slane %v502_v39, 2  ;;  %v509_v42 = vadd.f32 %v508_v40, %v493_v38 }
 0x209   :  { %v504_v43 = vadd.f32 %v503_v41, %v502_v39  ;;  %v510_v44 = vrot.slane %v509_v42, 2 }
 0x20b   :  { %v505_v45 = vrot.slane %v504_v43, 1  ;;  %v511_v46 = vadd.f32 %v510_v44, %v509_v42 }
 0x20d   :  { %v506_v47 = vadd.f32 %v505_v45, %v504_v43  ;;  %v512_v48 = vrot.slane %v511_v46, 1 }
 0x20f   :  { %v514_v49 = vmul.f32 0.125, %v506_v47  ;;  %v513_v50 = vadd.f32 %v512_v48, %v511_v46 }
 0x211   :  { %v516_v51 = vadd.f32 1e-05, %v514_v49  ;;  %v515_v52 = vmul.f32 0.125, %v513_v50 }
 0x213   :  { %992 = vrsqrt.f32 %v516_v51  ;;  %v517_v53 = vadd.f32 1e-05, %v515_v52 }
 0x215   :  { %994 = vrsqrt.f32 %v517_v53 }
 0x220   :  { %v993_v56 = vpop.eup %992 }
 0x221   :  { %v520_v58 = vmul.f32 %v993_v56, %v1121_v12 }
 0x222   :  { %v995_v59 = vpop.eup %994 }
 0x223   :  { %v525_v61 = vrot.slane %v520_v58, %v524_v54  ;;  %v521_v63 = vmul.f32 %v995_v59, %v1128_v17 }
 0x225   :  { %v530_v2 = vmul.f32 %v525_v61, %v488_v33  ;;  %v532_v3 = vmul.f32 %v525_v61, %v490_v60  ;;  %v529_v5 = vrot.slane %v521_v63, %v524_v54 }
 0x227   :  { %v542_v7 = vadd.f32 %v537_v62, %v530_v2  ;;  %v544_v8 = vadd.f32 %v537_v62, %v532_v3  ;;  %v531_v9 = vmul.f32 %v529_v5, %v489_v36  ;;  %v533_v10 = vmul.f32 %v529_v5, %v491_v4 }
 0x229   :  { %vm548_vm5 = vcmp.gt.f32.partialorder %v544_v8, 0.0  ;;  %v553_v13 = vmul.f32 %v550_v6, %v544_v8  ;;  %v543_v14 = vadd.f32 %v541_v1, %v531_v9  ;;  %v545_v15 = vadd.f32 %v541_v1, %v533_v10 }
 0x22a   :  { %vm546_vm6 = vcmp.gt.f32.partialorder %v542_v7, 0.0  ;;  %v551_v16 = vmul.f32 %v550_v6, %v542_v7 }
 0x22b   :  { %v554_v18 = vmul.f32 %v550_v6, %v545_v15  ;;  %vm547_vm7 = vcmp.gt.f32.partialorder %v543_v14, 0.0  ;;  %vm549_vm8 = vcmp.gt.f32.partialorder %v545_v15, 0.0  ;;  %v552_v19 = vmul.f32 %v550_v6, %v543_v14 }
 0x22c   :  { %v555_v20 = vsel %vm546_vm6, %v542_v7, %v551_v16  ;;  %v557_v21 = vsel %vm548_vm5, %v544_v8, %v553_v13 }
 0x22d   :  { %v556_v22 = vsel %vm547_vm7, %v543_v14, %v552_v19  ;;  %v558_v23 = vsel %vm549_vm8, %v545_v15, %v554_v18  ;;  %v559_v25 = vpack.c.bf16 %v557_v21, %v555_v20 }
 0x22e   :  { %v560_v24 = vpack.c.bf16 %v558_v23, %v556_v22 }
 0x230   :  { %793 = vmatprep.mubr.bf16.mxu0 %v560_v24 }
 0x231   :  { %794 = vmatmul.mubr.bf16.vlgmr.msra.gmra.mxu0 %v559_v25 }
 0x2f1   :  { %v795_v29 = vpop.f32.mrf.mxu0 }
 0x2f2   :  { %v796_v30 = vadd.f32 %v795_v29, %v596_v27 }
 0x2f3   :  { %v797_v31 = vpop.f32.mrf.mxu0 }
 0x2f4   :  { %804 = vst [vmem:[%s1161_s6] sm:$0xff] %v796_v30  ;;  %v798_v32 = vadd.f32 %v797_v31, %v600_v28 }
 0x2f5   :  { %v799_v33 = vpop.f32.mrf.mxu0 }
 0x2f6   :  { %805 = vst [vmem:[%s1161_s6 + $0x8] sm:$0xff] %v798_v32  ;;  %v800_v34 = vadd.f32 %v799_v33, %v596_v27 }
 0x2f7   :  { %v801_v35 = vpop.f32.mrf.mxu0 }
 0x2f8   :  { %806 = vst [vmem:[%s1161_s6 + $0x10] sm:$0xff] %v800_v34  ;;  %v802_v11 = vadd.f32 %v801_v35, %v600_v28 }
 0x2fa   :  { %807 = vst [vmem:[%s1161_s6 + $0x18] sm:$0xff] %v802_v11 }
 0x2fb   :  { %812 = vsyncpa [#allocation3], 1 }
 0x2fc   :  { %813 = vsyncpa [#allocation6], 1 }
 0x2fd   :  { %814 = vsyncpa [#allocation4], 1 }

</bundles_post_ra>
